<compile_context>
chip_gen: v5e
topology: v5e:2x2
jax: 0.10.0
libtpu: 0.0.40
codegen_flags: <defaults>
</compile_context>

<pallas_src>
import functools

import jax
import jax.numpy as jnp
from jax.experimental import pallas as pl
from jax.experimental.pallas import tpu as pltpu


def _round_up(x, m):
    return ((x + m - 1) // m) * m


# Batches at or above this size are split into >= 2 grid steps (v7x megacore).
_SPLIT_THRESHOLD_ROWS = 1024


def _choose_tile_n(n, max_tile_n):
    """Pick a batch tile: multiple of 8, <= max_tile_n, >= 2 balanced steps
    for large batches (so both v7x TensorCores get work)."""
    n8 = _round_up(max(n, 1), 8)
    tile_n = min(max_tile_n, n8)
    if n8 >= _SPLIT_THRESHOLD_ROWS:
        tile_n = min(tile_n, _round_up(-(-n8 // 2), 8))
    return max(tile_n, 8)


# ----------------------------------------------------------------------------
# Pallas kernel: 2 ReLU hidden layers + mix / means / log_std heads.
# Weights/biases are VMEM-resident (constant index_map); x / outputs are
# batch-tiled.  means/log_stds are written component-major: (C, tile_n, D).
# ----------------------------------------------------------------------------
def _gmm_mlp_kernel(x_ref, w1_ref, b1_ref, w2_ref, b2_ref,
                    wmix_ref, bmix_ref, wmean_ref, bmean_ref, wls_ref, bls_ref,
                    mix_ref, means_ref, ls_ref, *, num_comps, output_dim):
    compute_dtype = w1_ref.dtype          # bf16 (optimized) or f32 (exact)

    # Cast the f32 input rows in-kernel (cheap VPU op on an idle slot).
    x = x_ref[...].astype(compute_dtype)

    # hidden layer 1: relu(x @ W1 + b1)   (MXU, f32 accumulation)
    h = jnp.dot(x, w1_ref[...], preferred_element_type=jnp.float32) + b1_ref[...]
    h = jnp.maximum(h, 0.0).astype(compute_dtype)

    # hidden layer 2: relu(h @ W2 + b2)
    h = jnp.dot(h, w2_ref[...], preferred_element_type=jnp.float32) + b2_ref[...]
    h = jnp.maximum(h, 0.0).astype(compute_dtype)

    # mixture-logits head -> (tile_n, C)
    mix_ref[...] = (
        jnp.dot(h, wmix_ref[...], preferred_element_type=jnp.float32) + bmix_ref[...])

    # mean / log_std heads (fused over components in one matmul each), then
    # scattered into component-major output blocks so the torch vstack+view
    # becomes a free reshape outside the kernel.
    means = (jnp.dot(h, wmean_ref[...], preferred_element_type=jnp.float32)
             + bmean_ref[...])                      # (tile_n, C*D)
    log_stds = (jnp.dot(h, wls_ref[...], preferred_element_type=jnp.float32)
                + bls_ref[...])                     # (tile_n, C*D)

    d = output_dim
    for c in range(num_comps):                      # C is small and static
        means_ref[c, :, :] = means[:, c * d:(c + 1) * d]
        ls_ref[c, :, :] = log_stds[:, c * d:(c + 1) * d]


# ----------------------------------------------------------------------------
# Wrapper: tiling, specs, and (free) vstack/view reinterpretation.
# ----------------------------------------------------------------------------
@functools.partial(
    jax.jit,
    static_argnames=("num_comps", "output_dim", "use_bf16", "max_tile_n"),
)
def gmm_mlp_forward(x, params, *, num_comps, output_dim, use_bf16=True,
                    max_tile_n=2048):
    n, input_dim = x.shape
    (w1, b1, w2, b2, wmix, bmix, wmean, bmean, wls, bls) = params
    h1 = w1.shape[1]
    h2 = w2.shape[1]
    c, d = num_comps, output_dim

    compute_dtype = jnp.bfloat16 if use_bf16 else jnp.float32
    # Only the tiny, VMEM-resident weights are cast in the wrapper; x stays f32
    # (cast happens in-kernel), biases stay f32 for the f32 epilogues.
    w1k = w1.astype(compute_dtype)
    w2k = w2.astype(compute_dtype)
    wmixk = wmix.astype(compute_dtype)
    wmeank = wmean.astype(compute_dtype)
    wlsk = wls.astype(compute_dtype)
    b1k = b1.astype(jnp.float32)
    b2k = b2.astype(jnp.float32)
    bmixk = bmix.astype(jnp.float32)
    bmeank = bmean.astype(jnp.float32)
    blsk = bls.astype(jnp.float32)

    tile_n = _choose_tile_n(n, max_tile_n)
    grid = (pl.cdiv(n, tile_n),)          # final block may be ragged (masked)

    row_map = lambda i: (i, 0)            # x / mix tiles move with the grid
    head_map = lambda i: (0, i, 0)        # component-major head outputs
    const_map = lambda i: (0, 0)          # weights / biases: VMEM-resident

    head_cols = c + 2 * c * d
    flops = 2 * n * (input_dim * h1 + h1 * h2 + h2 * head_cols)
    bytes_accessed = 4 * (n * input_dim + n * head_cols
                          + input_dim * h1 + h1 * h2 + h2 * head_cols)

    kernel = functools.partial(_gmm_mlp_kernel, num_comps=c, output_dim=d)

    mix, means_cm, log_stds_cm = pl.pallas_call(
        kernel,
        out_shape=(
            jax.ShapeDtypeStruct((n, c), jnp.float32),        # mix logits
            jax.ShapeDtypeStruct((c, n, d), jnp.float32),     # means (comp-major)
            jax.ShapeDtypeStruct((c, n, d), jnp.float32),     # log_stds
        ),
        grid=grid,
        in_specs=[
            pl.BlockSpec((tile_n, input_dim), row_map),       # x (f32)
            pl.BlockSpec((input_dim, h1), const_map),         # W1
            pl.BlockSpec((1, h1), const_map),                 # b1
            pl.BlockSpec((h1, h2), const_map),                # W2
            pl.BlockSpec((1, h2), const_map),                 # b2
            pl.BlockSpec((h2, c), const_map),                 # W_mix
            pl.BlockSpec((1, c), const_map),                  # b_mix
            pl.BlockSpec((h2, c * d), const_map),             # W_means (fused)
            pl.BlockSpec((1, c * d), const_map),              # b_means
            pl.BlockSpec((h2, c * d), const_map),             # W_log_std (fused)
            pl.BlockSpec((1, c * d), const_map),              # b_log_std
        ],
        out_specs=(
            pl.BlockSpec((tile_n, c), row_map),
            pl.BlockSpec((c, tile_n, d), head_map),
            pl.BlockSpec((c, tile_n, d), head_map),
        ),
        compiler_params=pltpu.CompilerParams(
            dimension_semantics=("parallel",),                # 2 TCs on v7x
            vmem_limit_bytes=48 * 1024 * 1024,
        ),
        cost_estimate=pl.CostEstimate(
            flops=flops, transcendentals=0, bytes_accessed=bytes_accessed),
    )(x, w1k, b1k, w2k, b2k, wmixk, bmixk, wmeank, bmeank, wlsk, blsk)

    # torch: mix_head(x).reshape(-1, C)                -> identity on (N, C)
    # torch: vstack([head_c(x)]).view(-1, C, D)        -> component-major
    #   (C, N, D) buffer reinterpreted as (N, C, D): a free metadata reshape.
    return mix, means_cm.reshape(-1, c, d), log_stds_cm.reshape(-1, c, d)


# ----------------------------------------------------------------------------
# Deterministic parameter initialization (xavier normal weights, zero biases).
# ----------------------------------------------------------------------------
def _xavier_normal(key, fan_in, fan_out):
    std = (2.0 / (fan_in + fan_out)) ** 0.5
    return std * jax.random.normal(key, (fan_in, fan_out), dtype=jnp.float32)


def init_params(key, input_dim, hidden_sizes, num_comps, output_dim):
    assert len(hidden_sizes) == 2, "kernel is specialized to 2 hidden layers"
    h1, h2 = hidden_sizes
    keys = jax.random.split(key, 8)

    w1 = _xavier_normal(keys[0], input_dim, h1)
    b1 = jnp.zeros((1, h1), jnp.float32)
    w2 = _xavier_normal(keys[1], h1, h2)
    b2 = jnp.zeros((1, h2), jnp.float32)

    wmix = _xavier_normal(keys[2], h2, num_comps)
    bmix = jnp.zeros((1, num_comps), jnp.float32)

    mean_keys = jax.random.split(keys[3], num_comps)
    ls_keys = jax.random.split(keys[4], num_comps)
    wmean = jnp.concatenate(
        [_xavier_normal(k, h2, output_dim) for k in mean_keys], axis=1)
    wls = jnp.concatenate(
        [_xavier_normal(k, h2, output_dim) for k in ls_keys], axis=1)
    bmean = jnp.zeros((1, num_comps * output_dim), jnp.float32)
    bls = jnp.zeros((1, num_comps * output_dim), jnp.float32)

    return (w1, b1, w2, b2, wmix, bmix, wmean, bmean, wls, bls)


# ----------------------------------------------------------------------------
# Pure-JAX reference (mirrors the PyTorch forward).  `compute_dtype` lets it
# mirror the bf16 kernel math for tolerance checking.
# ----------------------------------------------------------------------------
def reference_forward(x, params, num_comps, output_dim,
                      compute_dtype=jnp.float32):
    (w1, b1, w2, b2, wmix, bmix, wmean, bmean, wls, bls) = params
    h = jnp.dot(x.astype(compute_dtype), w1.astype(compute_dtype),
                preferred_element_type=jnp.float32) + b1
    h = jnp.maximum(h, 0.0).astype(compute_dtype)
    h = jnp.dot(h, w2.astype(compute_dtype),
                preferred_element_type=jnp.float32) + b2
    h = jnp.maximum(h, 0.0).astype(compute_dtype)

    mix = (jnp.dot(h, wmix.astype(compute_dtype),
                   preferred_element_type=jnp.float32) + bmix).reshape(-1, num_comps)

    def heads(w_all, b_all):
        outs = []
        for ci in range(num_comps):
            wc = w_all[:, ci * output_dim:(ci + 1) * output_dim]
            bc = b_all[:, ci * output_dim:(ci + 1) * output_dim]
            outs.append(jnp.dot(h, wc.astype(compute_dtype),
                                preferred_element_type=jnp.float32) + bc)
        stacked = jnp.concatenate(outs, axis=0)              # torch.vstack
        return stacked.reshape(-1, num_comps, output_dim)    # .view(...)

    return mix, heads(wmean, bmean), heads(wls, bls)


if __name__ == "__main__":
    INPUT_DIM = 16
    HIDDEN_SIZES = (32, 32)
    NUM_COMPS = 4
    OUTPUT_DIM = 8

    key = jax.random.PRNGKey(0)
    kx, kp, kx2, kx3 = jax.random.split(key, 4)
    params = init_params(kp, INPUT_DIM, HIDDEN_SIZES, NUM_COMPS, OUTPUT_DIM)

    # ---- small batch, exact-semantics (f32) check ---------------------------
    N = 8
    x = jax.random.normal(kx, (N, INPUT_DIM), dtype=jnp.float32)

    mix_f32, means_f32, ls_f32 = gmm_mlp_forward(
        x, params, num_comps=NUM_COMPS, output_dim=OUTPUT_DIM, use_bf16=False)
    jax.block_until_ready((mix_f32, means_f32, ls_f32))

    mix_r, means_r, ls_r = reference_forward(x, params, NUM_COMPS, OUTPUT_DIM)
    assert mix_f32.shape == (N, NUM_COMPS)
    assert means_f32.shape == (N, NUM_COMPS, OUTPUT_DIM)
    assert ls_f32.shape == (N, NUM_COMPS, OUTPUT_DIM)
    assert jnp.allclose(mix_f32, mix_r, atol=1e-5)
    assert jnp.allclose(means_f32, means_r, atol=1e-5)
    assert jnp.allclose(ls_f32, ls_r, atol=1e-5)

    # ---- small NON-multiple-of-8 batch: exercises ragged-block write masking
    N3 = 13
    x3 = jax.random.normal(kx3, (N3, INPUT_DIM), dtype=jnp.float32)
    mix3, means3, ls3 = gmm_mlp_forward(
        x3, params, num_comps=NUM_COMPS, output_dim=OUTPUT_DIM, use_bf16=False)
    jax.block_until_ready((mix3, means3, ls3))
    mix3_r, means3_r, ls3_r = reference_forward(x3, params, NUM_COMPS, OUTPUT_DIM)
    assert mix3.shape == (N3, NUM_COMPS)
    assert means3.shape == (N3, NUM_COMPS, OUTPUT_DIM)
    assert jnp.allclose(mix3, mix3_r, atol=1e-5)
    assert jnp.allclose(means3, means3_r, atol=1e-5)
    assert jnp.allclose(ls3, ls3_r, atol=1e-5)

    # ---- small batch, optimized bf16 path ------------------------------------
    mix_bf, means_bf, ls_bf = gmm_mlp_forward(
        x, params, num_comps=NUM_COMPS, output_dim=OUTPUT_DIM, use_bf16=True)
    jax.block_until_ready((mix_bf, means_bf, ls_bf))
    mix_rb, means_rb, ls_rb = reference_forward(
        x, params, NUM_COMPS, OUTPUT_DIM, compute_dtype=jnp.bfloat16)
    assert jnp.allclose(mix_bf, mix_rb, atol=2e-3, rtol=2e-3)
    assert jnp.allclose(means_bf, means_rb, atol=2e-3, rtol=2e-3)
    assert jnp.allclose(ls_bf, ls_rb, atol=2e-3, rtol=2e-3)

    # ---- larger ragged batch: 2 balanced grid steps, ragged final block ------
    N2 = 2053
    x2 = jax.random.normal(kx2, (N2, INPUT_DIM), dtype=jnp.float32)
    mix2, means2, ls2 = gmm_mlp_forward(
        x2, params, num_comps=NUM_COMPS, output_dim=OUTPUT_DIM, use_bf16=True)
    jax.block_until_ready((mix2, means2, ls2))
    mix2_r, means2_r, ls2_r = reference_forward(
        x2, params, NUM_COMPS, OUTPUT_DIM, compute_dtype=jnp.bfloat16)
    assert mix2.shape == (N2, NUM_COMPS)
    assert means2.shape == (N2, NUM_COMPS, OUTPUT_DIM)
    assert ls2.shape == (N2, NUM_COMPS, OUTPUT_DIM)
    assert jnp.allclose(mix2, mix2_r, atol=2e-3, rtol=2e-3)
    assert jnp.allclose(means2, means2_r, atol=2e-3, rtol=2e-3)
    assert jnp.allclose(ls2, ls2_r, atol=2e-3, rtol=2e-3)

    print("KERNEL_OK")
</pallas_src>

<mosaic_0001>
module attributes {stable_mosaic.version = 11 : i64} {
  func.func @_gmm_mlp_kernel(%arg0: i32, %arg1: memref<8x16xf32, #tpu.memory_space<vmem>>, %arg2: memref<16x32xf32, #tpu.memory_space<vmem>>, %arg3: memref<1x32xf32, #tpu.memory_space<vmem>>, %arg4: memref<32x32xf32, #tpu.memory_space<vmem>>, %arg5: memref<1x32xf32, #tpu.memory_space<vmem>>, %arg6: memref<32x4xf32, #tpu.memory_space<vmem>>, %arg7: memref<1x4xf32, #tpu.memory_space<vmem>>, %arg8: memref<32x32xf32, #tpu.memory_space<vmem>>, %arg9: memref<1x32xf32, #tpu.memory_space<vmem>>, %arg10: memref<32x32xf32, #tpu.memory_space<vmem>>, %arg11: memref<1x32xf32, #tpu.memory_space<vmem>>, %arg12: memref<8x4xf32, #tpu.memory_space<vmem>>, %arg13: memref<4x8x8xf32, #tpu.memory_space<vmem>>, %arg14: memref<4x8x8xf32, #tpu.memory_space<vmem>>) attributes {dimension_semantics = [#tpu.dimension_semantics<parallel>], iteration_bounds = array<i64: 1>, scalar_prefetch = 0 : i64, scratch_operands = 0 : i64, tpu.core_type = #tpu.core_type<tc>, window_params = [{transform_indices = @transform_0, window_bounds = array<i64: 8, 16>}, {pipeline_mode = #tpu.pipeline_mode<synchronous>, transform_indices = @transform_1, window_bounds = array<i64: 16, 32>}, {pipeline_mode = #tpu.pipeline_mode<synchronous>, transform_indices = @transform_2, window_bounds = array<i64: 1, 32>}, {pipeline_mode = #tpu.pipeline_mode<synchronous>, transform_indices = @transform_3, window_bounds = array<i64: 32, 32>}, {pipeline_mode = #tpu.pipeline_mode<synchronous>, transform_indices = @transform_4, window_bounds = array<i64: 1, 32>}, {pipeline_mode = #tpu.pipeline_mode<synchronous>, transform_indices = @transform_5, window_bounds = array<i64: 32, 4>}, {pipeline_mode = #tpu.pipeline_mode<synchronous>, transform_indices = @transform_6, window_bounds = array<i64: 1, 4>}, {pipeline_mode = #tpu.pipeline_mode<synchronous>, transform_indices = @transform_7, window_bounds = array<i64: 32, 32>}, {pipeline_mode = #tpu.pipeline_mode<synchronous>, transform_indices = @transform_8, window_bounds = array<i64: 1, 32>}, {pipeline_mode = #tpu.pipeline_mode<synchronous>, transform_indices = @transform_9, window_bounds = array<i64: 32, 32>}, {pipeline_mode = #tpu.pipeline_mode<synchronous>, transform_indices = @transform_10, window_bounds = array<i64: 1, 32>}, {transform_indices = @transform_11, window_bounds = array<i64: 8, 4>}, {transform_indices = @transform_12, window_bounds = array<i64: 4, 8, 8>}, {transform_indices = @transform_13, window_bounds = array<i64: 4, 8, 8>}]} {
    %c0 = arith.constant 0 : index
    %c0_0 = arith.constant 0 : index
    %0 = vector.load %arg1[%c0, %c0_0] : memref<8x16xf32, #tpu.memory_space<vmem>>, vector<8x16xf32>
    %c0_1 = arith.constant 0 : index
    %c0_2 = arith.constant 0 : index
    %1 = vector.load %arg2[%c0_1, %c0_2] : memref<16x32xf32, #tpu.memory_space<vmem>>, vector<16x32xf32>
    %cst = arith.constant dense<0.000000e+00> : vector<8x32xf32>
    %2 = tpu.matmul %0, %1, %cst {dimension_numbers = #tpu.dot_dimension_numbers<[1], [0], [0], [1], [0, 0, 1, 1], [], []>} : vector<8x16xf32>, vector<16x32xf32>, vector<8x32xf32> -> vector<8x32xf32>
    %c0_3 = arith.constant 0 : index
    %c0_4 = arith.constant 0 : index
    %3 = vector.load %arg3[%c0_3, %c0_4] : memref<1x32xf32, #tpu.memory_space<vmem>>, vector<1x32xf32>
    %4 = vector.broadcast %3 : vector<1x32xf32> to vector<8x32xf32>
    %5 = arith.addf %2, %4 : vector<8x32xf32>
    %cst_5 = arith.constant 0.000000e+00 : f32
    %6 = vector.broadcast %cst_5 : f32 to vector<8x32xf32>
    %7 = arith.maximumf %5, %6 : vector<8x32xf32>
    %c0_6 = arith.constant 0 : index
    %c0_7 = arith.constant 0 : index
    %8 = vector.load %arg4[%c0_6, %c0_7] : memref<32x32xf32, #tpu.memory_space<vmem>>, vector<32x32xf32>
    %cst_8 = arith.constant dense<0.000000e+00> : vector<8x32xf32>
    %9 = tpu.matmul %7, %8, %cst_8 {dimension_numbers = #tpu.dot_dimension_numbers<[1], [0], [0], [1], [0, 0, 1, 1], [], []>} : vector<8x32xf32>, vector<32x32xf32>, vector<8x32xf32> -> vector<8x32xf32>
    %c0_9 = arith.constant 0 : index
    %c0_10 = arith.constant 0 : index
    %10 = vector.load %arg5[%c0_9, %c0_10] : memref<1x32xf32, #tpu.memory_space<vmem>>, vector<1x32xf32>
    %11 = vector.broadcast %10 : vector<1x32xf32> to vector<8x32xf32>
    %12 = arith.addf %9, %11 : vector<8x32xf32>
    %cst_11 = arith.constant 0.000000e+00 : f32
    %13 = vector.broadcast %cst_11 : f32 to vector<8x32xf32>
    %14 = arith.maximumf %12, %13 : vector<8x32xf32>
    %c0_12 = arith.constant 0 : index
    %c0_13 = arith.constant 0 : index
    %15 = vector.load %arg6[%c0_12, %c0_13] : memref<32x4xf32, #tpu.memory_space<vmem>>, vector<32x4xf32>
    %cst_14 = arith.constant dense<0.000000e+00> : vector<8x4xf32>
    %16 = tpu.matmul %14, %15, %cst_14 {dimension_numbers = #tpu.dot_dimension_numbers<[1], [0], [0], [1], [0, 0, 1, 1], [], []>} : vector<8x32xf32>, vector<32x4xf32>, vector<8x4xf32> -> vector<8x4xf32>
    %c0_15 = arith.constant 0 : index
    %c0_16 = arith.constant 0 : index
    %17 = vector.load %arg7[%c0_15, %c0_16] : memref<1x4xf32, #tpu.memory_space<vmem>>, vector<1x4xf32>
    %18 = vector.broadcast %17 : vector<1x4xf32> to vector<8x4xf32>
    %19 = arith.addf %16, %18 : vector<8x4xf32>
    %c0_17 = arith.constant 0 : index
    %c0_18 = arith.constant 0 : index
    %20 = vector.load %arg12[%c0_17, %c0_18] : memref<8x4xf32, #tpu.memory_space<vmem>>, vector<8x4xf32>
    tpu.vector_store %arg12[%c0_17, %c0_18], %19 {strides = array<i32>} : memref<8x4xf32, #tpu.memory_space<vmem>>, vector<8x4xf32>,
    %c0_19 = arith.constant 0 : index
    %c0_20 = arith.constant 0 : index
    %21 = vector.load %arg8[%c0_19, %c0_20] : memref<32x32xf32, #tpu.memory_space<vmem>>, vector<32x32xf32>
    %cst_21 = arith.constant dense<0.000000e+00> : vector<8x32xf32>
    %22 = tpu.matmul %14, %21, %cst_21 {dimension_numbers = #tpu.dot_dimension_numbers<[1], [0], [0], [1], [0, 0, 1, 1], [], []>} : vector<8x32xf32>, vector<32x32xf32>, vector<8x32xf32> -> vector<8x32xf32>
    %c0_22 = arith.constant 0 : index
    %c0_23 = arith.constant 0 : index
    %23 = vector.load %arg9[%c0_22, %c0_23] : memref<1x32xf32, #tpu.memory_space<vmem>>, vector<1x32xf32>
    %24 = vector.broadcast %23 : vector<1x32xf32> to vector<8x32xf32>
    %25 = arith.addf %22, %24 : vector<8x32xf32>
    %c0_24 = arith.constant 0 : index
    %c0_25 = arith.constant 0 : index
    %26 = vector.load %arg10[%c0_24, %c0_25] : memref<32x32xf32, #tpu.memory_space<vmem>>, vector<32x32xf32>
    %cst_26 = arith.constant dense<0.000000e+00> : vector<8x32xf32>
    %27 = tpu.matmul %14, %26, %cst_26 {dimension_numbers = #tpu.dot_dimension_numbers<[1], [0], [0], [1], [0, 0, 1, 1], [], []>} : vector<8x32xf32>, vector<32x32xf32>, vector<8x32xf32> -> vector<8x32xf32>
    %c0_27 = arith.constant 0 : index
    %c0_28 = arith.constant 0 : index
    %28 = vector.load %arg11[%c0_27, %c0_28] : memref<1x32xf32, #tpu.memory_space<vmem>>, vector<1x32xf32>
    %29 = vector.broadcast %28 : vector<1x32xf32> to vector<8x32xf32>
    %30 = arith.addf %27, %29 : vector<8x32xf32>
    %31 = vector.extract_strided_slice %25 {offsets = [0, 0], sizes = [8, 8], strides = [1, 1]} : vector<8x32xf32> to vector<8x8xf32>
    %c0_29 = arith.constant 0 : index
    %c0_30 = arith.constant 0 : index
    %c0_31 = arith.constant 0 : index
    %32 = vector.load %arg13[%c0_29, %c0_30, %c0_31] : memref<4x8x8xf32, #tpu.memory_space<vmem>>, vector<1x8x8xf32>
    %33 = vector.shape_cast %32 : vector<1x8x8xf32> to vector<8x8xf32>
    %34 = vector.shape_cast %31 : vector<8x8xf32> to vector<1x8x8xf32>
    tpu.vector_store %arg13[%c0_29, %c0_30, %c0_31], %34 {strides = array<i32>} : memref<4x8x8xf32, #tpu.memory_space<vmem>>, vector<1x8x8xf32>,
    %35 = vector.extract_strided_slice %30 {offsets = [0, 0], sizes = [8, 8], strides = [1, 1]} : vector<8x32xf32> to vector<8x8xf32>
    %c0_32 = arith.constant 0 : index
    %c0_33 = arith.constant 0 : index
    %c0_34 = arith.constant 0 : index
    %36 = vector.load %arg14[%c0_32, %c0_33, %c0_34] : memref<4x8x8xf32, #tpu.memory_space<vmem>>, vector<1x8x8xf32>
    %37 = vector.shape_cast %36 : vector<1x8x8xf32> to vector<8x8xf32>
    %38 = vector.shape_cast %35 : vector<8x8xf32> to vector<1x8x8xf32>
    tpu.vector_store %arg14[%c0_32, %c0_33, %c0_34], %38 {strides = array<i32>} : memref<4x8x8xf32, #tpu.memory_space<vmem>>, vector<1x8x8xf32>,
    %39 = vector.extract_strided_slice %25 {offsets = [0, 8], sizes = [8, 8], strides = [1, 1]} : vector<8x32xf32> to vector<8x8xf32>
    %c1 = arith.constant 1 : index
    %c0_35 = arith.constant 0 : index
    %c0_36 = arith.constant 0 : index
    %40 = vector.load %arg13[%c1, %c0_35, %c0_36] : memref<4x8x8xf32, #tpu.memory_space<vmem>>, vector<1x8x8xf32>
    %41 = vector.shape_cast %40 : vector<1x8x8xf32> to vector<8x8xf32>
    %42 = vector.shape_cast %39 : vector<8x8xf32> to vector<1x8x8xf32>
    tpu.vector_store %arg13[%c1, %c0_35, %c0_36], %42 {strides = array<i32>} : memref<4x8x8xf32, #tpu.memory_space<vmem>>, vector<1x8x8xf32>,
    %43 = vector.extract_strided_slice %30 {offsets = [0, 8], sizes = [8, 8], strides = [1, 1]} : vector<8x32xf32> to vector<8x8xf32>
    %c1_37 = arith.constant 1 : index
    %c0_38 = arith.constant 0 : index
    %c0_39 = arith.constant 0 : index
    %44 = vector.load %arg14[%c1_37, %c0_38, %c0_39] : memref<4x8x8xf32, #tpu.memory_space<vmem>>, vector<1x8x8xf32>
    %45 = vector.shape_cast %44 : vector<1x8x8xf32> to vector<8x8xf32>
    %46 = vector.shape_cast %43 : vector<8x8xf32> to vector<1x8x8xf32>
    tpu.vector_store %arg14[%c1_37, %c0_38, %c0_39], %46 {strides = array<i32>} : memref<4x8x8xf32, #tpu.memory_space<vmem>>, vector<1x8x8xf32>,
    %47 = vector.extract_strided_slice %25 {offsets = [0, 16], sizes = [8, 8], strides = [1, 1]} : vector<8x32xf32> to vector<8x8xf32>
    %c2 = arith.constant 2 : index
    %c0_40 = arith.constant 0 : index
    %c0_41 = arith.constant 0 : index
    %48 = vector.load %arg13[%c2, %c0_40, %c0_41] : memref<4x8x8xf32, #tpu.memory_space<vmem>>, vector<1x8x8xf32>
    %49 = vector.shape_cast %48 : vector<1x8x8xf32> to vector<8x8xf32>
    %50 = vector.shape_cast %47 : vector<8x8xf32> to vector<1x8x8xf32>
    tpu.vector_store %arg13[%c2, %c0_40, %c0_41], %50 {strides = array<i32>} : memref<4x8x8xf32, #tpu.memory_space<vmem>>, vector<1x8x8xf32>,
    %51 = vector.extract_strided_slice %30 {offsets = [0, 16], sizes = [8, 8], strides = [1, 1]} : vector<8x32xf32> to vector<8x8xf32>
    %c2_42 = arith.constant 2 : index
    %c0_43 = arith.constant 0 : index
    %c0_44 = arith.constant 0 : index
    %52 = vector.load %arg14[%c2_42, %c0_43, %c0_44] : memref<4x8x8xf32, #tpu.memory_space<vmem>>, vector<1x8x8xf32>
    %53 = vector.shape_cast %52 : vector<1x8x8xf32> to vector<8x8xf32>
    %54 = vector.shape_cast %51 : vector<8x8xf32> to vector<1x8x8xf32>
    tpu.vector_store %arg14[%c2_42, %c0_43, %c0_44], %54 {strides = array<i32>} : memref<4x8x8xf32, #tpu.memory_space<vmem>>, vector<1x8x8xf32>,
    %55 = vector.extract_strided_slice %25 {offsets = [0, 24], sizes = [8, 8], strides = [1, 1]} : vector<8x32xf32> to vector<8x8xf32>
    %c3 = arith.constant 3 : index
    %c0_45 = arith.constant 0 : index
    %c0_46 = arith.constant 0 : index
    %56 = vector.load %arg13[%c3, %c0_45, %c0_46] : memref<4x8x8xf32, #tpu.memory_space<vmem>>, vector<1x8x8xf32>
    %57 = vector.shape_cast %56 : vector<1x8x8xf32> to vector<8x8xf32>
    %58 = vector.shape_cast %55 : vector<8x8xf32> to vector<1x8x8xf32>
    tpu.vector_store %arg13[%c3, %c0_45, %c0_46], %58 {strides = array<i32>} : memref<4x8x8xf32, #tpu.memory_space<vmem>>, vector<1x8x8xf32>,
    %59 = vector.extract_strided_slice %30 {offsets = [0, 24], sizes = [8, 8], strides = [1, 1]} : vector<8x32xf32> to vector<8x8xf32>
    %c3_47 = arith.constant 3 : index
    %c0_48 = arith.constant 0 : index
    %c0_49 = arith.constant 0 : index
    %60 = vector.load %arg14[%c3_47, %c0_48, %c0_49] : memref<4x8x8xf32, #tpu.memory_space<vmem>>, vector<1x8x8xf32>
    %61 = vector.shape_cast %60 : vector<1x8x8xf32> to vector<8x8xf32>
    %62 = vector.shape_cast %59 : vector<8x8xf32> to vector<1x8x8xf32>
    tpu.vector_store %arg14[%c3_47, %c0_48, %c0_49], %62 {strides = array<i32>} : memref<4x8x8xf32, #tpu.memory_space<vmem>>, vector<1x8x8xf32>,
    return
  }
  func.func @transform_0(%arg0: i32) -> (i32, i32) {
    %c0_i32 = arith.constant 0 : i32
    %c0_i32_0 = arith.constant 0 : i32
    return %arg0, %c0_i32 : i32, i32
  }
  func.func @transform_1(%arg0: i32) -> (i32, i32) {
    %c0_i32 = arith.constant 0 : i32
    %c0_i32_0 = arith.constant 0 : i32
    %c0_i32_1 = arith.constant 0 : i32
    return %c0_i32, %c0_i32_0 : i32, i32
  }
  func.func @transform_2(%arg0: i32) -> (i32, i32) {
    %c0_i32 = arith.constant 0 : i32
    %c0_i32_0 = arith.constant 0 : i32
    %c0_i32_1 = arith.constant 0 : i32
    return %c0_i32, %c0_i32_0 : i32, i32
  }
  func.func @transform_3(%arg0: i32) -> (i32, i32) {
    %c0_i32 = arith.constant 0 : i32
    %c0_i32_0 = arith.constant 0 : i32
    %c0_i32_1 = arith.constant 0 : i32
    return %c0_i32, %c0_i32_0 : i32, i32
  }
  func.func @transform_4(%arg0: i32) -> (i32, i32) {
    %c0_i32 = arith.constant 0 : i32
    %c0_i32_0 = arith.constant 0 : i32
    %c0_i32_1 = arith.constant 0 : i32
    return %c0_i32, %c0_i32_0 : i32, i32
  }
  func.func @transform_5(%arg0: i32) -> (i32, i32) {
    %c0_i32 = arith.constant 0 : i32
    %c0_i32_0 = arith.constant 0 : i32
    %c0_i32_1 = arith.constant 0 : i32
    return %c0_i32, %c0_i32_0 : i32, i32
  }
  func.func @transform_6(%arg0: i32) -> (i32, i32) {
    %c0_i32 = arith.constant 0 : i32
    %c0_i32_0 = arith.constant 0 : i32
    %c0_i32_1 = arith.constant 0 : i32
    return %c0_i32, %c0_i32_0 : i32, i32
  }
  func.func @transform_7(%arg0: i32) -> (i32, i32) {
    %c0_i32 = arith.constant 0 : i32
    %c0_i32_0 = arith.constant 0 : i32
    %c0_i32_1 = arith.constant 0 : i32
    return %c0_i32, %c0_i32_0 : i32, i32
  }
  func.func @transform_8(%arg0: i32) -> (i32, i32) {
    %c0_i32 = arith.constant 0 : i32
    %c0_i32_0 = arith.constant 0 : i32
    %c0_i32_1 = arith.constant 0 : i32
    return %c0_i32, %c0_i32_0 : i32, i32
  }
  func.func @transform_9(%arg0: i32) -> (i32, i32) {
    %c0_i32 = arith.constant 0 : i32
    %c0_i32_0 = arith.constant 0 : i32
    %c0_i32_1 = arith.constant 0 : i32
    return %c0_i32, %c0_i32_0 : i32, i32
  }
  func.func @transform_10(%arg0: i32) -> (i32, i32) {
    %c0_i32 = arith.constant 0 : i32
    %c0_i32_0 = arith.constant 0 : i32
    %c0_i32_1 = arith.constant 0 : i32
    return %c0_i32, %c0_i32_0 : i32, i32
  }
  func.func @transform_11(%arg0: i32) -> (i32, i32) {
    %c0_i32 = arith.constant 0 : i32
    %c0_i32_0 = arith.constant 0 : i32
    return %arg0, %c0_i32 : i32, i32
  }
  func.func @transform_12(%arg0: i32) -> (i32, i32, i32) {
    %c0_i32 = arith.constant 0 : i32
    %c0_i32_0 = arith.constant 0 : i32
    %c0_i32_1 = arith.constant 0 : i32
    return %c0_i32, %arg0, %c0_i32_0 : i32, i32, i32
  }
  func.func @transform_13(%arg0: i32) -> (i32, i32, i32) {
    %c0_i32 = arith.constant 0 : i32
    %c0_i32_0 = arith.constant 0 : i32
    %c0_i32_1 = arith.constant 0 : i32
    return %c0_i32, %arg0, %c0_i32_0 : i32, i32, i32
  }
}

</mosaic_0001>

<bundles_post_ra>
// kernel: gmm_mlp_forward.1
= control target key start
LH: loop header
LB: loop body
LE: loop exit
PB: predicated region body
PF: predicated region fallthrough
CT: control target
= control target key end

     0   :  { %19 = vsyncpa [#allocation3], 0  ;;  %s679_s0 = inlined_call_operand.hbm [shape: f32[8,16], index: 0, kind: input, shape index: {}]   ;;  %s680_s1 = inlined_call_operand.hbm [shape: f32[16,32], index: 1, kind: input, shape index: {}]   ;;  %s681_s2 = inlined_call_operand.vmem [shape: f32[1,32], index: 2, kind: input, shape index: {}]   ;;  %s682_s3 = inlined_call_operand.vmem [shape: f32[32,32], index: 3, kind: input, shape index: {}]   ;;  %s683_s4 = inlined_call_operand.vmem [shape: f32[1,32], index: 4, kind: input, shape index: {}]   ;;  %s684_s5 = inlined_call_operand.vmem [shape: f32[32,4], index: 5, kind: input, shape index: {}]   ;;  %s685_s6 = inlined_call_operand.vmem [shape: f32[1,4], index: 6, kind: input, shape index: {}]   ;;  %s686_s7 = inlined_call_operand.hbm [shape: f32[32,32], index: 7, kind: input, shape index: {}]   ;;  %s687_s8 = inlined_call_operand.vmem [shape: f32[1,32], index: 8, kind: input, shape index: {}]   ;;  %s688_s9 = inlined_call_operand.hbm [shape: f32[32,32], index: 9, kind: input, shape index: {}]   ;;  %s689_s10 = inlined_call_operand.vmem [shape: f32[1,32], index: 10, kind: input, shape index: {}]   ;;  %s690_s11 = inlined_call_operand.vmem [shape: f32[8,4], index: 11, kind: output, shape index: {0}]   ;;  %s691_s12 = inlined_call_operand.hbm [shape: f32[4,8,8], index: 12, kind: output, shape index: {1}]   ;;  %s692_s13 = inlined_call_operand.hbm [shape: f32[4,8,8], index: 13, kind: output, shape index: {2}]  }
   0x1   :  { %20 = vsyncpa [#allocation6], 0 }
   0x2   :  { %21 = vsyncpa [#allocation9], 0 }
   0x3   :  { %22 = vsyncpa [#allocation4], 0  ;;  %s39_s27 = sshll.u32 %s680_s1, 4  ;;  %s40_s27 = int_to_ptr.hbm [resolvable:$true] %s39_s27 }
   0x4   :  { %23 = vsyncpa [#allocation12], 0  ;;  %s511_s28 = smov [#allocation5]   ;;  %s29_s15 = sshll.u32 %s679_s0, 4  ;;  %s30_s15 = int_to_ptr.hbm [resolvable:$true] %s29_s15 }
   0x5   :  { %s41_s29 = sshll.u32 %s511_s28, 4  ;;  %s512_s16 = smov 128   ;;  %s42_s29 = int_to_ptr.vmem [resolvable:$true] %s41_s29 }
   0x6   :  { %s513_s17 = smov 8   ;;  %s514_s18 = smov [#allocation2]  }
   0x7   :  { %47 = dma.hbm_to_vmem [thread:$0]  %s40_s27, 256, %s42_s29, [#allocation6], %s512_s16, %s512_s16, %s513_s17  }
   0x8   :  { %s31_s19 = sshll.u32 %s514_s18, 4  ;;  %s62_s21 = sshll.u32 %s686_s7, 4  ;;  %s32_s19 = int_to_ptr.vmem [resolvable:$true] %s31_s19  ;;  %s63_s21 = int_to_ptr.hbm [resolvable:$true] %s62_s21 }
   0x9   :  { %34 = dma.hbm_to_vmem [thread:$0]  %s30_s15, 128, %s32_s19, [#allocation3]  }
   0xa   :  { %s77_s0 = sshll.u32 %s688_s9, 4  ;;  %s515_s24 = smov [#allocation7]   ;;  %s78_s0 = int_to_ptr.hbm [resolvable:$true] %s77_s0 }
   0xb   :  { %s64_s25 = sshll.u32 %s515_s24, 4  ;;  %s516_s26 = smov [#allocation8]   ;;  %s65_s25 = int_to_ptr.vmem [resolvable:$true] %s64_s25 }
   0xc   :  { %70 = dma.hbm_to_vmem [thread:$0]  %s63_s21, 512, %s65_s25, [#allocation6], %s512_s16, %s512_s16, %s513_s17  }
   0xd   :  { %s79_s27 = sshll.u32 %s516_s26, 4  ;;  %s80_s27 = int_to_ptr.vmem [resolvable:$true] %s79_s27 }
   0xe   :  { %85 = dma.hbm_to_vmem [thread:$0]  %s78_s0, 512, %s80_s27, [#allocation9], %s512_s16, %s512_s16, %s513_s17  }
   0xf   :  { %501 = dma.done.wait [#allocation3], 128  }
  0x10   :  { %502 = vsyncadd [#allocation3], 4294967168 }
  0x11   :  { %503 = dma.done.wait [#allocation6], 768  }
  0x12   :  { %504 = vsyncadd [#allocation6], 4294966528 }
  0x13   :  { %505 = dma.done.wait [#allocation9], 512  }
  0x14   :  { %506 = vsyncadd [#allocation9], 4294966784  ;;  %v106_v0 = vld [vmem:[#allocation5 + $0x8] sm:$0xff]  ;;  %v105_v1 = vld [vmem:[#allocation5] sm:$0xff]  ;;  %vm111_vm0 = vcmask 130048   ;;  %vm144_vm1 = vcmask 261120  }
  0x15   :  { %129 = vmatpush.msra.mxu0 %v106_v0  ;;  %v104_v2 = vld [vmem:[#allocation2] sm:$0xff]  ;;  %v139_v3 = vld [vmem:[%s682_s3 + $0x18] sm:$0xff]  ;;  %v138_v4 = vld [vmem:[%s682_s3 + $0x10] sm:$0xff]  ;;  %vm258_vm2 = vcmask 64512   ;;  %vm200_vm3 = vcmask 31744   ;;  %s517_s30 = smov 104  }
  0x16   :  { %160 = vmatpush.msra.mxu1 %v139_v3  ;;  %v137_v5 = vld [vmem:[%s682_s3 + $0x8] sm:$0xff]  ;;  %v136_v6 = vld [vmem:[%s682_s3] sm:$0xff]  ;;  %v172_v7 = vld [vmem:[%s684_s5 + $0x18] sm:$0xff]  ;;  %s518_s14 = smov 112   ;;  %s301_s19 = sshll.u32 %s691_s12, 4  ;;  %s302_s19 = int_to_ptr.hbm [resolvable:$true] %s301_s19 }
  0x17   :  { %130 = vmatpush.msra.mxu0 %v105_v1  ;;  %v205_v8 = vld [vmem:[#allocation7 + $0x18] sm:$0xff]  ;;  %192 = vmatpush.msra.mxu2 %v172_v7  ;;  %v352_v10 = vld [vmem:[%s681_s2] ss:$0 sm:$0xff]  ;;  %v204_v15 = vld [vmem:[#allocation7 + $0x10] sm:$0xff]  ;;  %s521_s20 = smov [#allocation11]   ;;  %s314_s22 = sshll.u32 %s692_s13, 4  ;;  %s315_s22 = int_to_ptr.hbm [resolvable:$true] %s314_s22 }
  0x18   :  { %336 = vmatmul.msk.f32.vlgmr.msra.gmra.mxu0 %vm111_vm0, %v104_v2  ;;  %161 = vmatpush.msra.mxu1 %v138_v4  ;;  %v233_v9 = vld [vmem:[#allocation8 + $0x18] sm:$0xff]  ;;  %v232_v16 = vld [vmem:[#allocation8 + $0x10] sm:$0xff]  ;;  %v203_v18 = vld [vmem:[#allocation7 + $0x8] sm:$0xff]  ;;  %s312_s1 = sshll.u32 %s521_s20, 4  ;;  %s313_s1 = int_to_ptr.vmem [resolvable:$true] %s312_s1 }
  0x19   :  { %222 = vmatpush.msra.mxu3 %v205_v8  ;;  %250 = vmatpush.msrb.mxu0 %v233_v9  ;;  %v171_v14 = vld [vmem:[%s684_s5 + $0x10] sm:$0xff]  ;;  %v170_v17 = vld [vmem:[%s684_s5 + $0x8] sm:$0xff]  ;;  %v231_v19 = vld [vmem:[#allocation8 + $0x8] sm:$0xff] }
  0x1a   :  { %162 = vmatpush.msra.mxu1 %v137_v5  ;;  %193 = vmatpush.msra.mxu2 %v171_v14  ;;  %v169_v20 = vld [vmem:[%s684_s5] sm:$0xff]  ;;  %v202_v21 = vld [vmem:[#allocation7] sm:$0xff] }
  0x1b   :  { %223 = vmatpush.msra.mxu3 %v204_v15  ;;  %251 = vmatpush.msrb.mxu0 %v232_v16  ;;  %v230_v22 = vld [vmem:[#allocation8] sm:$0xff]  ;;  %v353_v23 = vld [vmem:[%s683_s4] ss:$0 sm:$0xff] }
  0x1c   :  { %163 = vmatpush.msra.mxu1 %v136_v6  ;;  %194 = vmatpush.msra.mxu2 %v170_v17  ;;  %v354_v27 = vld [vmem:[%s689_s10] ss:$0 sm:$0xff] }
  0x1d   :  { %224 = vmatpush.msra.mxu3 %v203_v18  ;;  %252 = vmatpush.msrb.mxu0 %v231_v19  ;;  %v355_v30 = vld [vmem:[%s685_s6] ss:$0 sm:$0xff]  ;;  %s519_s6 = smov 120  }
  0x1e   :  { %195 = vmatpush.msra.mxu2 %v169_v20  ;;  %v356_v31 = vld [vmem:[%s687_s8] ss:$0 sm:$0xff]  ;;  %s520_s8 = smov [#allocation10]  }
  0x1f   :  { %225 = vmatpush.msra.mxu3 %v202_v21  ;;  %253 = vmatpush.msrb.mxu0 %v230_v22  ;;  %s299_s15 = sshll.u32 %s520_s8, 4  ;;  %s300_s15 = int_to_ptr.vmem [resolvable:$true] %s299_s15 }
  0x95   :  { %v132_v11 = vpop.f32.mrf.mxu0 }
  0x96   :  { %v133_v12 = vadd.f32 %v352_v10, %v132_v11 }
  0x98   :  { %v135_v13 = vmax.f32 %v133_v12, 0.0 }
  0x9a   :  { %337 = vmatmul.msk.f32.vlgmr.msra.gmra.mxu1 %vm144_vm1, %v135_v13 }
 0x117   :  { %v165_v24 = vpop.f32.mrf.mxu1 }
 0x118   :  { %v166_v25 = vadd.f32 %v353_v23, %v165_v24 }
 0x11a   :  { %v168_v26 = vmax.f32 %v166_v25, 0.0 }
 0x11c   :  { %338 = vmatmul.msk.f32.vlgmr.msra.gmra.mxu2 %vm144_vm1, %v168_v26  ;;  %339 = vmatmul.msk.f32.vlgmr.msra.gmra.mxu3 %vm144_vm1, %v168_v26 }
 0x11d   :  { %340 = vmatmul.msk.f32.vlgmr.msrb.gmra.mxu0 %vm144_vm1, %v168_v26 }
 0x19a   :  { %v255_v28 = vpop.f32.mrf.mxu0 }
 0x19b   :  { %v256_v29 = vadd.f32 %v354_v27, %v255_v28 }
 0x19d   :  { %260 = vst.msk [vmem:[#allocation11] sm:$0xff] %vm258_vm2, %v256_v29 }
 0x19f   :  { %v197_v32 = vpop.f32.mrf.mxu2  ;;  %v227_v33 = vpop.f32.mrf.mxu3 }
 0x1a0   :  { %v198_v34 = vadd.f32 %v355_v30, %v197_v32  ;;  %v228_v35 = vadd.f32 %v356_v31, %v227_v33 }
 0x1a2   :  { %201 = vst.msk [vmem:[%s690_s11] sm:$0xff] %vm200_vm3, %v198_v34  ;;  %283 = vrot.lane.b32.xlu2 %v228_v35, %s517_s30  ;;  %273 = vrot.lane.b32.xlu1 %v228_v35, %s518_s14 }
 0x1a3   :  { %259 = vst.msk [vmem:[#allocation10] sm:$0xff] %vm258_vm2, %v228_v35  ;;  %262 = vrot.lane.b32.xlu0 %v228_v35, %s519_s6 }
 0x1aa   :  { %288 = vrot.lane.b32.xlu2 %v256_v29, %s517_s30  ;;  %278 = vrot.lane.b32.xlu1 %v256_v29, %s518_s14 }
 0x1ab   :  { %268 = vrot.lane.b32.xlu0 %v256_v29, %s519_s6 }
 0x1fc   :  { %v284_v36 = vpop.permute.xlu2 %283 }
 0x1fd   :  { %287 = vst.msk [vmem:[#allocation10 + $0x18] sm:$0xff] %vm258_vm2, %v284_v36 }
 0x204   :  { %v289_v37 = vpop.permute.xlu2 %288 }
 0x205   :  { %292 = vst.msk [vmem:[#allocation11 + $0x18] sm:$0xff] %vm258_vm2, %v289_v37 }
 0x214   :  { %v274_v38 = vpop.permute.xlu1 %273 }
 0x215   :  { %277 = vst.msk [vmem:[#allocation10 + $0x10] sm:$0xff] %vm258_vm2, %v274_v38  ;;  %v263_v39 = vpop.permute.xlu0 %262 }
 0x216   :  { %266 = vst.msk [vmem:[#allocation10 + $0x8] sm:$0xff] %vm258_vm2, %v263_v39 }
 0x217   :  { %307 = dma.vmem_to_hbm [thread:$0]  %s300_s15, 512, %s302_s19, [#allocation4], %s512_s16, %s512_s16, %s513_s17  }
 0x21c   :  { %v279_v40 = vpop.permute.xlu1 %278 }
 0x21d   :  { %282 = vst.msk [vmem:[#allocation11 + $0x10] sm:$0xff] %vm258_vm2, %v279_v40  ;;  %v269_v41 = vpop.permute.xlu0 %268 }
 0x21e   :  { %272 = vst.msk [vmem:[#allocation11 + $0x8] sm:$0xff] %vm258_vm2, %v269_v41 }
 0x21f   :  { %320 = dma.vmem_to_hbm [thread:$0]  %s313_s1, 512, %s315_s22, [#allocation12], %s512_s16, %s512_s16, %s513_s17  }
 0x220   :  { %507 = dma.done.wait [#allocation4], 512  }
 0x221   :  { %508 = vsyncadd [#allocation4], 4294966784 }
 0x222   :  { %509 = dma.done.wait [#allocation12], 512  }
 0x223   :  { %510 = vsyncadd [#allocation12], 4294966784 }
 0x224   :  { %331 = vsyncpa [#allocation3], 1 }
 0x225   :  { %332 = vsyncpa [#allocation6], 1 }
 0x226   :  { %333 = vsyncpa [#allocation9], 1 }
 0x227   :  { %334 = vsyncpa [#allocation4], 1 }
 0x228   :  { %335 = vsyncpa [#allocation12], 1 }

</bundles_post_ra>
